<compile_context>
chip_gen: v7x
topology: tpu7x:2x2x1
jax: 0.10.0
libtpu: 0.0.40
codegen_flags: <defaults>
</compile_context>

<pallas_src>
import functools

import jax
import jax.numpy as jnp
from jax.experimental import pallas as pl
from jax.experimental.pallas import tpu as pltpu


IN_DIM = 9        # 9-dimensional unit state
HIDDEN = 128
OUT_DIM = 64

_SQRT_2_OVER_PI = 0.7978845608028654
_INV_SQRT_2 = 0.7071067811865476


def _round_up(a, m):
    return (a + m - 1) // m * m


def _gelu_tanh(x):
    # tanh-approximate GELU: the transcendental goes to the EUP slot.
    x3 = x * x * x
    return 0.5 * x * (1.0 + jnp.tanh(_SQRT_2_OVER_PI * (x + 0.044715 * x3)))


def _gelu_erf(x):
    # PyTorch nn.GELU() default (exact erf); heavier VALU polynomial.
    return 0.5 * x * (1.0 + jax.lax.erf(x * _INV_SQRT_2))


def _has_bf16_vpu():
    """v6e / v7x have packed-bf16 VPU/EUP; v5e and older do not."""
    try:
        kind = jax.devices()[0].device_kind.lower()
    except Exception:
        return False
    return not any(t in kind for t in ("v2", "v3", "v4", "v5"))


def _unit_encoder_kernel(x_ref, w1_ref, b1_ref, w2_ref, b2_ref, w3_ref, b3_ref,
                         o_ref, *, gelu_fn, gelu_dtype):
    # fc1: (T, 9) @ (9, 128)   -- bf16 MXU inputs, f32 accumulate, f32 bias add.
    h = jnp.dot(x_ref[...], w1_ref[...],
                preferred_element_type=jnp.float32) + b1_ref[...]
    h = gelu_fn(h.astype(gelu_dtype))
    # Dropout(p=0.1) -> identity in eval mode.

    # fc2: (T, 128) @ (128, 128)
    h = jnp.dot(h.astype(jnp.bfloat16), w2_ref[...],
                preferred_element_type=jnp.float32) + b2_ref[...]
    h = gelu_fn(h.astype(gelu_dtype))
    # Dropout(p=0.1) -> identity in eval mode.

    # fc3: (T, 128) @ (128, 64) -- unpadded: GELU only over the 64 real columns.
    h = jnp.dot(h.astype(jnp.bfloat16), w3_ref[...],
                preferred_element_type=jnp.float32) + b3_ref[...]
    o_ref[...] = gelu_fn(h.astype(gelu_dtype)).astype(o_ref.dtype)


def unit_encoder(x, kernel_params, *, tile_n=2048, use_tanh_gelu=True,
                 out_dtype=jnp.float32):
    """x: (N, IN_DIM). Returns (N, OUT_DIM) in out_dtype."""
    w1, b1, w2, b2, w3, b3 = kernel_params
    n, in_dim = x.shape
    assert in_dim == IN_DIM

    # Halve x DMA bytes; the MXU consumes it as bf16 anyway.
    x = x.astype(jnp.bfloat16)

    # Shrink the tile for small batches, keep it a multiple of 16 (bf16 pack).
    tile = min(tile_n, _round_up(n, 16))
    tile = max(16, (tile // 16) * 16)
    padded_n = _round_up(n, tile)
    if padded_n != n:
        x = jnp.pad(x, ((0, padded_n - n), (0, 0)))

    grid = (padded_n // tile,)

    gelu_fn = _gelu_tanh if use_tanh_gelu else _gelu_erf
    # Packed-bf16 GELU only with the tanh form and only on chips with a bf16
    # VPU/EUP path; erf / v5e keep f32 (no bf16 vector path there).
    gelu_dtype = (jnp.bfloat16 if (use_tanh_gelu and _has_bf16_vpu())
                  else jnp.float32)

    kernel = functools.partial(_unit_encoder_kernel,
                               gelu_fn=gelu_fn, gelu_dtype=gelu_dtype)

    def whole(i):  # weights/biases: same single resident block every step
        return (0, 0)

    out = pl.pallas_call(
        kernel,
        out_shape=jax.ShapeDtypeStruct((padded_n, OUT_DIM), out_dtype),
        grid_spec=pltpu.PrefetchScalarGridSpec(
            num_scalar_prefetch=0,
            grid=grid,
            in_specs=[
                pl.BlockSpec((tile, IN_DIM), lambda i: (i, 0)),     # x (bf16)
                pl.BlockSpec((IN_DIM, HIDDEN), whole),              # W1 (bf16)
                pl.BlockSpec((1, HIDDEN), whole),                   # b1 (f32)
                pl.BlockSpec((HIDDEN, HIDDEN), whole),              # W2 (bf16)
                pl.BlockSpec((1, HIDDEN), whole),                   # b2 (f32)
                pl.BlockSpec((HIDDEN, OUT_DIM), whole),             # W3 (bf16)
                pl.BlockSpec((1, OUT_DIM), whole),                  # b3 (f32)
            ],
            out_specs=pl.BlockSpec((tile, OUT_DIM), lambda i: (i, 0)),
        ),
        compiler_params=pltpu.CompilerParams(
            dimension_semantics=("parallel",)),
    )(x, w1, b1, w2, b2, w3, b3)

    if padded_n != n:
        out = out[:n]
    return out


def init_params(key):
    """f32 master params mimicking PyTorch nn.Linear init (uniform ±1/sqrt(fan_in)).
    Weights stored (in_features, out_features) so x @ W + b == x @ W_pt.T + b."""
    def linear(key, fan_in, fan_out):
        kw, kb = jax.random.split(key)
        bound = 1.0 / jnp.sqrt(fan_in)
        w = jax.random.uniform(kw, (fan_in, fan_out), jnp.float32, -bound, bound)
        b = jax.random.uniform(kb, (1, fan_out), jnp.float32, -bound, bound)
        return w, b

    k1, k2, k3 = jax.random.split(key, 3)
    w1, b1 = linear(k1, IN_DIM, HIDDEN)
    w2, b2 = linear(k2, HIDDEN, HIDDEN)
    w3, b3 = linear(k3, HIDDEN, OUT_DIM)
    return (w1, b1, w2, b2, w3, b3)


def prepare_kernel_params(params):
    """Cast weights to bf16 for the MXU; biases stay f32; no output padding."""
    w1, b1, w2, b2, w3, b3 = params
    return (w1.astype(jnp.bfloat16), b1,
            w2.astype(jnp.bfloat16), b2,
            w3.astype(jnp.bfloat16), b3)


def unit_encoder_ref(x, params):
    """Pure-JAX f32 reference (matches the PyTorch module in eval mode)."""
    w1, b1, w2, b2, w3, b3 = params
    g = lambda v: 0.5 * v * (1.0 + jax.lax.erf(v * _INV_SQRT_2))
    h = g(x @ w1 + b1)
    h = g(h @ w2 + b2)
    return g(h @ w3 + b3)


if __name__ == "__main__":
    key = jax.random.PRNGKey(0)
    kp, kx = jax.random.split(key)

    params = init_params(kp)
    kparams = prepare_kernel_params(params)

    # Small batch of unit states: (batch=40, in_dim=9).  tile_n=16 exercises a
    # multi-step grid plus the row-padding path at small scale.
    n = 40
    x = jax.random.normal(kx, (n, IN_DIM), jnp.float32)

    out = unit_encoder(x, kparams, tile_n=16)
    out = jax.block_until_ready(out)

    ref = unit_encoder_ref(x, params)
    assert out.shape == (n, OUT_DIM), out.shape
    # bf16 MXU inputs + tanh-approx GELU vs the pure-f32 exact-erf reference.
    err = float(jnp.max(jnp.abs(out - ref)))
    assert jnp.allclose(out, ref, atol=3e-2, rtol=3e-2), err

    print("KERNEL_OK")
</pallas_src>

<mosaic_0001>
module attributes {stable_mosaic.version = 11 : i64} {
  func.func @_unit_encoder_kernel(%arg0: i32, %arg1: memref<16x9xbf16, #tpu.memory_space<vmem>>, %arg2: memref<9x128xbf16, #tpu.memory_space<vmem>>, %arg3: memref<1x128xf32, #tpu.memory_space<vmem>>, %arg4: memref<128x128xbf16, #tpu.memory_space<vmem>>, %arg5: memref<1x128xf32, #tpu.memory_space<vmem>>, %arg6: memref<128x64xbf16, #tpu.memory_space<vmem>>, %arg7: memref<1x64xf32, #tpu.memory_space<vmem>>, %arg8: memref<16x64xf32, #tpu.memory_space<vmem>>) attributes {dimension_semantics = [#tpu.dimension_semantics<parallel>], iteration_bounds = array<i64: 3>, scalar_prefetch = 0 : i64, scratch_operands = 0 : i64, tpu.core_type = #tpu.core_type<tc>, window_params = [{transform_indices = @transform_0, window_bounds = array<i64: 16, 9>}, {pipeline_mode = #tpu.pipeline_mode<synchronous>, transform_indices = @transform_1, window_bounds = array<i64: 9, 128>}, {pipeline_mode = #tpu.pipeline_mode<synchronous>, transform_indices = @transform_2, window_bounds = array<i64: 1, 128>}, {pipeline_mode = #tpu.pipeline_mode<synchronous>, transform_indices = @transform_3, window_bounds = array<i64: 128, 128>}, {pipeline_mode = #tpu.pipeline_mode<synchronous>, transform_indices = @transform_4, window_bounds = array<i64: 1, 128>}, {pipeline_mode = #tpu.pipeline_mode<synchronous>, transform_indices = @transform_5, window_bounds = array<i64: 128, 64>}, {pipeline_mode = #tpu.pipeline_mode<synchronous>, transform_indices = @transform_6, window_bounds = array<i64: 1, 64>}, {transform_indices = @transform_7, window_bounds = array<i64: 16, 64>}]} {
    %c0 = arith.constant 0 : index
    %c0_0 = arith.constant 0 : index
    %0 = vector.load %arg1[%c0, %c0_0] : memref<16x9xbf16, #tpu.memory_space<vmem>>, vector<16x9xbf16>
    %c0_1 = arith.constant 0 : index
    %c0_2 = arith.constant 0 : index
    %1 = vector.load %arg2[%c0_1, %c0_2] : memref<9x128xbf16, #tpu.memory_space<vmem>>, vector<9x128xbf16>
    %cst = arith.constant dense<0.000000e+00> : vector<16x128xf32>
    %2 = tpu.matmul %0, %1, %cst {dimension_numbers = #tpu.dot_dimension_numbers<[1], [0], [0], [1], [0, 0, 1, 1], [], []>} : vector<16x9xbf16>, vector<9x128xbf16>, vector<16x128xf32> -> vector<16x128xf32>
    %c0_3 = arith.constant 0 : index
    %c0_4 = arith.constant 0 : index
    %3 = vector.load %arg3[%c0_3, %c0_4] : memref<1x128xf32, #tpu.memory_space<vmem>>, vector<1x128xf32>
    %4 = vector.broadcast %3 : vector<1x128xf32> to vector<16x128xf32>
    %5 = arith.addf %2, %4 : vector<16x128xf32>
    %6 = arith.truncf %5 : vector<16x128xf32> to vector<16x128xbf16>
    %7 = arith.mulf %6, %6 : vector<16x128xbf16>
    %8 = arith.mulf %7, %6 : vector<16x128xbf16>
    %cst_5 = arith.constant 5.000000e-01 : bf16
    %9 = vector.broadcast %cst_5 : bf16 to vector<16x128xbf16>
    %10 = arith.mulf %9, %6 : vector<16x128xbf16>
    %cst_6 = arith.constant 4.467770e-02 : bf16
    %11 = vector.broadcast %cst_6 : bf16 to vector<16x128xbf16>
    %12 = arith.mulf %11, %8 : vector<16x128xbf16>
    %13 = arith.addf %6, %12 : vector<16x128xbf16>
    %cst_7 = arith.constant 7.968750e-01 : bf16
    %14 = vector.broadcast %cst_7 : bf16 to vector<16x128xbf16>
    %15 = arith.mulf %14, %13 : vector<16x128xbf16>
    %16 = math.tanh %15 : vector<16x128xbf16>
    %cst_8 = arith.constant 1.000000e+00 : bf16
    %17 = vector.broadcast %cst_8 : bf16 to vector<16x128xbf16>
    %18 = arith.addf %17, %16 : vector<16x128xbf16>
    %19 = arith.mulf %10, %18 : vector<16x128xbf16>
    %c0_9 = arith.constant 0 : index
    %c0_10 = arith.constant 0 : index
    %20 = vector.load %arg4[%c0_9, %c0_10] : memref<128x128xbf16, #tpu.memory_space<vmem>>, vector<128x128xbf16>
    %cst_11 = arith.constant dense<0.000000e+00> : vector<16x128xf32>
    %21 = tpu.matmul %19, %20, %cst_11 {dimension_numbers = #tpu.dot_dimension_numbers<[1], [0], [0], [1], [0, 0, 1, 1], [], []>} : vector<16x128xbf16>, vector<128x128xbf16>, vector<16x128xf32> -> vector<16x128xf32>
    %c0_12 = arith.constant 0 : index
    %c0_13 = arith.constant 0 : index
    %22 = vector.load %arg5[%c0_12, %c0_13] : memref<1x128xf32, #tpu.memory_space<vmem>>, vector<1x128xf32>
    %23 = vector.broadcast %22 : vector<1x128xf32> to vector<16x128xf32>
    %24 = arith.addf %21, %23 : vector<16x128xf32>
    %25 = arith.truncf %24 : vector<16x128xf32> to vector<16x128xbf16>
    %26 = arith.mulf %25, %25 : vector<16x128xbf16>
    %27 = arith.mulf %26, %25 : vector<16x128xbf16>
    %cst_14 = arith.constant 5.000000e-01 : bf16
    %28 = vector.broadcast %cst_14 : bf16 to vector<16x128xbf16>
    %29 = arith.mulf %28, %25 : vector<16x128xbf16>
    %cst_15 = arith.constant 4.467770e-02 : bf16
    %30 = vector.broadcast %cst_15 : bf16 to vector<16x128xbf16>
    %31 = arith.mulf %30, %27 : vector<16x128xbf16>
    %32 = arith.addf %25, %31 : vector<16x128xbf16>
    %cst_16 = arith.constant 7.968750e-01 : bf16
    %33 = vector.broadcast %cst_16 : bf16 to vector<16x128xbf16>
    %34 = arith.mulf %33, %32 : vector<16x128xbf16>
    %35 = math.tanh %34 : vector<16x128xbf16>
    %cst_17 = arith.constant 1.000000e+00 : bf16
    %36 = vector.broadcast %cst_17 : bf16 to vector<16x128xbf16>
    %37 = arith.addf %36, %35 : vector<16x128xbf16>
    %38 = arith.mulf %29, %37 : vector<16x128xbf16>
    %c0_18 = arith.constant 0 : index
    %c0_19 = arith.constant 0 : index
    %39 = vector.load %arg6[%c0_18, %c0_19] : memref<128x64xbf16, #tpu.memory_space<vmem>>, vector<128x64xbf16>
    %cst_20 = arith.constant dense<0.000000e+00> : vector<16x64xf32>
    %40 = tpu.matmul %38, %39, %cst_20 {dimension_numbers = #tpu.dot_dimension_numbers<[1], [0], [0], [1], [0, 0, 1, 1], [], []>} : vector<16x128xbf16>, vector<128x64xbf16>, vector<16x64xf32> -> vector<16x64xf32>
    %c0_21 = arith.constant 0 : index
    %c0_22 = arith.constant 0 : index
    %41 = vector.load %arg7[%c0_21, %c0_22] : memref<1x64xf32, #tpu.memory_space<vmem>>, vector<1x64xf32>
    %42 = vector.broadcast %41 : vector<1x64xf32> to vector<16x64xf32>
    %43 = arith.addf %40, %42 : vector<16x64xf32>
    %44 = arith.truncf %43 : vector<16x64xf32> to vector<16x64xbf16>
    %45 = arith.mulf %44, %44 : vector<16x64xbf16>
    %46 = arith.mulf %45, %44 : vector<16x64xbf16>
    %cst_23 = arith.constant 5.000000e-01 : bf16
    %47 = vector.broadcast %cst_23 : bf16 to vector<16x64xbf16>
    %48 = arith.mulf %47, %44 : vector<16x64xbf16>
    %cst_24 = arith.constant 4.467770e-02 : bf16
    %49 = vector.broadcast %cst_24 : bf16 to vector<16x64xbf16>
    %50 = arith.mulf %49, %46 : vector<16x64xbf16>
    %51 = arith.addf %44, %50 : vector<16x64xbf16>
    %cst_25 = arith.constant 7.968750e-01 : bf16
    %52 = vector.broadcast %cst_25 : bf16 to vector<16x64xbf16>
    %53 = arith.mulf %52, %51 : vector<16x64xbf16>
    %54 = math.tanh %53 : vector<16x64xbf16>
    %cst_26 = arith.constant 1.000000e+00 : bf16
    %55 = vector.broadcast %cst_26 : bf16 to vector<16x64xbf16>
    %56 = arith.addf %55, %54 : vector<16x64xbf16>
    %57 = arith.mulf %48, %56 : vector<16x64xbf16>
    %58 = arith.extf %57 : vector<16x64xbf16> to vector<16x64xf32>
    %c0_27 = arith.constant 0 : index
    %c0_28 = arith.constant 0 : index
    %59 = vector.load %arg8[%c0_27, %c0_28] : memref<16x64xf32, #tpu.memory_space<vmem>>, vector<16x64xf32>
    tpu.vector_store %arg8[%c0_27, %c0_28], %58 {strides = array<i32>} : memref<16x64xf32, #tpu.memory_space<vmem>>, vector<16x64xf32>,
    return
  }
  func.func @transform_0(%arg0: i32) -> (i32, i32) {
    %c0_i32 = arith.constant 0 : i32
    %c0_i32_0 = arith.constant 0 : i32
    return %arg0, %c0_i32 : i32, i32
  }
  func.func @transform_1(%arg0: i32) -> (i32, i32) {
    %c0_i32 = arith.constant 0 : i32
    %c0_i32_0 = arith.constant 0 : i32
    %c0_i32_1 = arith.constant 0 : i32
    return %c0_i32, %c0_i32_0 : i32, i32
  }
  func.func @transform_2(%arg0: i32) -> (i32, i32) {
    %c0_i32 = arith.constant 0 : i32
    %c0_i32_0 = arith.constant 0 : i32
    %c0_i32_1 = arith.constant 0 : i32
    return %c0_i32, %c0_i32_0 : i32, i32
  }
  func.func @transform_3(%arg0: i32) -> (i32, i32) {
    %c0_i32 = arith.constant 0 : i32
    %c0_i32_0 = arith.constant 0 : i32
    %c0_i32_1 = arith.constant 0 : i32
    return %c0_i32, %c0_i32_0 : i32, i32
  }
  func.func @transform_4(%arg0: i32) -> (i32, i32) {
    %c0_i32 = arith.constant 0 : i32
    %c0_i32_0 = arith.constant 0 : i32
    %c0_i32_1 = arith.constant 0 : i32
    return %c0_i32, %c0_i32_0 : i32, i32
  }
  func.func @transform_5(%arg0: i32) -> (i32, i32) {
    %c0_i32 = arith.constant 0 : i32
    %c0_i32_0 = arith.constant 0 : i32
    %c0_i32_1 = arith.constant 0 : i32
    return %c0_i32, %c0_i32_0 : i32, i32
  }
  func.func @transform_6(%arg0: i32) -> (i32, i32) {
    %c0_i32 = arith.constant 0 : i32
    %c0_i32_0 = arith.constant 0 : i32
    %c0_i32_1 = arith.constant 0 : i32
    return %c0_i32, %c0_i32_0 : i32, i32
  }
  func.func @transform_7(%arg0: i32) -> (i32, i32) {
    %c0_i32 = arith.constant 0 : i32
    %c0_i32_0 = arith.constant 0 : i32
    return %arg0, %c0_i32 : i32, i32
  }
}

</mosaic_0001>

<bundles_post_ra>
// kernel: tpu_custom_call.1
= control target key start
LH: loop header
LB: loop body
LE: loop exit
PB: predicated region body
PF: predicated region fallthrough
CT: control target
= control target key end

     0   :  { %12 = vsyncpa [#allocation3], 0  ;;  %s1154_s0 = inlined_call_operand.vmem [shape: bf16[48,9], index: 0, kind: input, shape index: {}]   ;;  %s1155_s1 = inlined_call_operand.vmem [shape: bf16[9,128], index: 1, kind: input, shape index: {}]   ;;  %s1156_s2 = inlined_call_operand.vmem [shape: f32[1,128], index: 2, kind: input, shape index: {}]   ;;  %s1157_s3 = inlined_call_operand.vmem [shape: bf16[128,128], index: 3, kind: input, shape index: {}]   ;;  %s1158_s4 = inlined_call_operand.vmem [shape: f32[1,128], index: 4, kind: input, shape index: {}]   ;;  %s1159_s5 = inlined_call_operand.vmem [shape: bf16[128,64], index: 5, kind: input, shape index: {}]   ;;  %s1160_s6 = inlined_call_operand.vmem [shape: f32[1,64], index: 6, kind: input, shape index: {}]   ;;  %s1161_s7 = inlined_call_operand.hbm [shape: f32[48,64], index: 7, kind: output, shape index: {}]  }
   0x1   :  { %14 = vsyncpa [#allocation3 + $0x1], 0  ;;  %s972_s24 = smov 0   ;;  %s974_s25 = smov 0  }
   0x2   :  { %s976_s26 = smov 0   ;;  %s978_s27 = smov 0  }
   0x3 LB: > { %s993_s28 = sadd.s32 4294967295, %s924_s27   ;;  %s693_s29 = sadd.s32 4294967294, %s924_s27   ;;  %s924_s27 = sphi %s978_s27, %s1167_s27   ;;  %s920_s26 = sphi %s976_s26, %s1166_s26   ;;  %s916_s25 = sphi %s974_s25, %s1165_s25   ;;  %s912_s24 = sphi %s972_s24, %s1164_s24  }
   0x4   : > { %s997_s30 = sadd.s32 1, %s924_s27   ;;  %s179_s8 = sadd.s32 1, %s920_s26 }
   0x5   : > { %s176_s9 = ssub.s32 %s924_s27, %s997_s30  ;;  %p189_p0 = scmp.ne.s32.totalorder %s920_s26, %s916_s25 }
   0x6   : > { %p177_p1 = scmp.eq.s32.totalorder %s176_s9, 0  ;;  %p190_p2 = scmp.eq.s32.totalorder %s993_s28, 2 }
   0x7   : > { %p195_p3 = scmp.ne.s32.totalorder %s916_s25, %s912_s24  ;;  %p196_p4 = scmp.eq.s32.totalorder %s693_s29, 2 }
   0x8   : > { %s1008_s10 = scalar_select %p177_p1, %s920_s26, %s179_s8  }
   0x9   : > { %p1010_p5 = por %p190_p2, %p189_p0  ;;  %p1014_p6 = por %p196_p4, %p195_p3 }
   0xa   : > { %p696_p7 = scmp.ge.s32.totalorder %s924_s27, 1  ;;  %p241_p8 = scmp.lt.s32.totalorder %s924_s27, 4 }
   0xc   : > { %p242_p9 = pnand %p696_p7, %p241_p8 }
   0xd   : > { %vm310_vm0 = vcmask (!%p242_p9), 1043456   ;;  %v926_v0 = vmov (!%p242_p9), 0.0   ;;  %v838_v1 = vld [vmem:[%s1155_s1] sm:$0x1f] (!%p242_p9)   ;;  %vm311_vm1 = vcmask (!%p242_p9), 1044480   ;;  %s698_s15 = sshll.u32 (!%p242_p9), %s993_s28, 1 }
   0xe   : > { %245 = sbr.rel (%p242_p9) target bundleno = 774 (0x306), region = 48  ;;  %748 = vmatprep.subr.bf16.mxu0 (!%p242_p9), %v926_v0  ;;  %754 = vmatprep.subr.bf16.mxu1 (!%p242_p9), %v926_v0  ;;  %v927_v2 = vmov (!%p242_p9), 65535   ;;  %vm928_vm2 = vmmov (!%p242_p9), 0   ;;  %p274_p10 = scmp.lt.s32.totalorder (!%p242_p9), %s698_s15, 5  ;;  %vm306_vm3 = vcmask (!%p242_p9), 72704   ;;  %v840_v7 = vld [vmem:[%s1157_s3] sm:$0xff] (!%p242_p9)  }
   0xf   : > { %v312_v3 = vsel (!%p242_p9), %vm310_vm0, 4294967295, %v927_v2  ;;  %750 = vmatprep.mubr.msk.bf16.mxu0 (!%p242_p9), %vm928_vm2, %v926_v0  ;;  %770 = vmatprep.mubr.msk.bf16.mxu1 (!%p242_p9), %vm928_vm2, %v926_v0  ;;  %v841_v8 = vld [vmem:[%s1157_s3 + $0x8] sm:$0xff] (!%p242_p9)   ;;  %v842_v9 = vld [vmem:[%s1157_s3 + $0x10] sm:$0xff] (!%p242_p9)   ;;  %v843_v10 = vld [vmem:[%s1157_s3 + $0x18] sm:$0xff] (!%p242_p9)   ;;  %s727_s18 = sshll.u32 (!%p242_p9), %s993_s28, 8  ;;  %vm614_vm4 = vcmask (!%p242_p9), 523264  }
  0x10   : > { %v313_v4 = vsel (!%p242_p9), %vm311_vm1, %v312_v3, 0  ;;  %755 = vmatpush3.bf16.msra.mxu1 (!%p242_p9), %v840_v7  ;;  %v844_v11 = vld [vmem:[%s1157_s3 + $0x20] sm:$0xff] (!%p242_p9)   ;;  %v845_v12 = vld [vmem:[%s1157_s3 + $0x28] sm:$0xff] (!%p242_p9)   ;;  %v846_v13 = vld [vmem:[%s1157_s3 + $0x30] sm:$0xff] (!%p242_p9)   ;;  %s1109_s23 = scalar_lea.hbm (!%p242_p9), %s1161_s7, %s727_s18  ;;  %s929_s8 = smov (!%p242_p9), [#allocation2]  }
  0x11   : > { %v315_v5 = vand.u32 (!%p242_p9), %v838_v1, %v313_v4  ;;  %756 = vmatprep.subr.bf16.mxu1 (!%p242_p9), %v926_v0  ;;  %v847_v14 = vld [vmem:[%s1157_s3 + $0x38] sm:$0xff] (!%p242_p9)   ;;  %v700_v15 = vld [vmem:[%s1156_s2] ss:$0 sm:$0xff] (!%p242_p9)  ;;  %v849_v33 = vld [vmem:[%s1159_s5 + $0x8] sm:$0xff] (!%p242_p9)   ;;  %s866_s9 = sshll.u32 (!%p242_p9), %s929_s8, 4  ;;  %s867_s9 = int_to_ptr.vmem [resolvable:$false] %s866_s9 }
  0x12   : > { %v848_v32 = vld [vmem:[%s1159_s5] sm:$0xff] (!%p242_p9)   ;;  %v850_v34 = vld [vmem:[%s1159_s5 + $0x10] sm:$0xff] (!%p242_p9)   ;;  %v851_v35 = vld [vmem:[%s1159_s5 + $0x18] sm:$0xff] (!%p242_p9)   ;;  %s868_s13 = scalar_lea.vmem (!%p242_p9), %s867_s9, 512 }
  0x13   : > { %749 = vmatpush3.bf16.msra.mxu0 (!%p242_p9), %v315_v5  ;;  %v852_v36 = vld [vmem:[%s1159_s5 + $0x20] sm:$0xff] (!%p242_p9)   ;;  %v853_v37 = vld [vmem:[%s1159_s5 + $0x28] sm:$0xff] (!%p242_p9)   ;;  %v854_v38 = vld [vmem:[%s1159_s5 + $0x30] sm:$0xff] (!%p242_p9)  }
  0x14   : > { %774 = vmatprep.subr.bf16.mxu0 (!%p242_p9), %v926_v0  ;;  %757 = vmatpush3.bf16.msra.mxu1 (!%p242_p9), %v841_v8  ;;  %v855_v39 = vld [vmem:[%s1159_s5 + $0x38] sm:$0xff] (!%p242_p9)   ;;  %v704_v40 = vld [vmem:[%s1158_s4] ss:$0 sm:$0xff] (!%p242_p9) }
  0x15   : > { %s1169_s15 = smov (!%p274_p10, %s698_s15), 5  ;;  %758 = vmatprep.subr.bf16.mxu1 %v926_v0  ;;  %v713_v57 = vld [vmem:[%s1160_s6] ss:$0 sm:$0xff] }
  0x16   : > { %s699_s16 = sshll.u32 %s1169_s15, 2 }
  0x17   : > { %s277_s19 = scalar_lea.vmem %s1154_s0, %s699_s16  ;;  %s270_s16 = sand.u32 1, %s916_s25  }
  0x18   : > { %v839_v6 = vld [vmem:[%s277_s19] sm:$0xff]   ;;  %759 = vmatpush3.bf16.msra.mxu1 %v842_v9  ;;  %s697_s17 = sshll.u32 %s270_s16, 4  ;;  %s1113_s29 = scalar_lea.sflag [#allocation3], %s270_s16 }
  0x19   : > { %751 = vmatmul.mubr.msk.bf16.vlgmr.msra.gmra.mrb[0].mxu0 %vm306_vm3, %v839_v6  ;;  %760 = vmatprep.subr.bf16.mxu1 %v926_v0  ;;  %s272_s19 = scalar_lea.vmem [#allocation2], %s697_s17 }
  0x1a   : > { %790 = vmatprep.mubr.msk.bf16.mxu0 %vm928_vm2, %v926_v0  ;;  %775 = vmatpush3.bf16.msra.mxu0 %v848_v32  ;;  %s631_s20 = sshll.u32 %s272_s19, 4  ;;  %s1111_s20 = int_to_ptr.vmem [resolvable:$true] %s631_s20 }
  0x1b   : > { %776 = vmatprep.subr.bf16.mxu0 %v926_v0  ;;  %s862_s28 = scalar_lea.vmem %s1111_s20, 256  ;;  %p869_p0 = scmp.lt.s32.totalorder %s1111_s20, %s867_s9 }
  0x1c   : > { %761 = vmatpush3.bf16.msra.mxu1 %v843_v10  ;;  %p863_p11 = scmp.ne.s32.totalorder %s1111_s20, %s862_s28  ;;  %p870_p1 = scmp.lt.s32.totalorder %s868_s13, %s862_s28 }
  0x1d   : > { %762 = vmatprep.subr.bf16.mxu1 %v926_v0 }
  0x1e   : > { %777 = vmatpush3.bf16.msra.mxu0 %v849_v33  ;;  %p864_p12 = pnand %p863_p11, %p1010_p5  ;;  %p871_p2 = por %p870_p1, %p869_p0 }
  0x1f   : > { %778 = vmatprep.subr.bf16.mxu0 %v926_v0 }
  0x20   : > { %763 = vmatpush3.bf16.msra.mxu1 %v844_v11  ;;  %p865_p13 = pneg %p864_p12 }
  0x21   : > { %764 = vmatprep.subr.bf16.mxu1 %v926_v0 }
  0x22   : > { %779 = vmatpush3.bf16.msra.mxu0 %v850_v34  ;;  %p872_p3 = pnand %p871_p2, %p865_p13 }
  0x23   : > { %780 = vmatprep.subr.bf16.mxu0 %v926_v0 }
  0x24   : > { %765 = vmatpush3.bf16.msra.mxu1 %v845_v12 }
  0x25   : > { %766 = vmatprep.subr.bf16.mxu1 %v926_v0 }
  0x26   : > { %781 = vmatpush3.bf16.msra.mxu0 %v851_v35 }
  0x27   : > { %782 = vmatprep.subr.bf16.mxu0 %v926_v0 }
  0x28   : > { %767 = vmatpush3.bf16.msra.mxu1 %v846_v13 }
  0x29   : > { %768 = vmatprep.subr.bf16.mxu1 %v926_v0 }
  0x2a   : > { %783 = vmatpush3.bf16.msra.mxu0 %v852_v36 }
  0x2b   : > { %784 = vmatprep.subr.bf16.mxu0 %v926_v0 }
  0x2c   : > { %769 = vmatpush3.bf16.msra.mxu1 %v847_v14 }
  0x2e   : > { %785 = vmatpush3.bf16.msra.mxu0 %v853_v37 }
  0x2f   : > { %786 = vmatprep.subr.bf16.mxu0 %v926_v0 }
  0x32   : > { %787 = vmatpush3.bf16.msra.mxu0 %v854_v38 }
  0x33   : > { %788 = vmatprep.subr.bf16.mxu0 %v926_v0 }
  0x36   : > { %789 = vmatpush3.bf16.msra.mxu0 %v855_v39 }
  0xec   : > { %v351_v16 = vpop.f32.mrb[0].mxu0 }
  0xed   : > { %v752_v17 = vpop.f32.mrb[1].mxu0  ;;  %v352_v19 = vadd.f32 %v700_v15, %v351_v16 }
  0xee   : > { %v354_v18 = vpop.f32.mrb[2].mxu0 }
  0xef   : > { %v355_v20 = vadd.f32 %v700_v15, %v354_v18  ;;  %v753_v21 = vpop.f32.mrb[3].mxu0 }
  0xf1   : > { %v358_v22 = vpack.c.bf16 %v355_v20, %v352_v19 }
  0xf3   : > { %v359_v23 = vmul.bf16 %v358_v22, %v358_v22  ;;  %v361_v29 = vmul.bf16 1056980736, %v358_v22 }
  0xf5   : > { %v360_v24 = vmul.bf16 %v359_v23, %v358_v22 }
  0xf7   : > { %v362_v25 = vmul.bf16 1027030327, %v360_v24 }
  0xf9   : > { %v363_v26 = vadd.bf16 %v362_v25, %v358_v22 }
  0xfb   : > { %v364_v27 = vmul.bf16 1061961548, %v363_v26 }
  0xfd   : > { %856 = vtanh.bf16 %v364_v27 }
 0x108   : > { %v857_v28 = vpop.eup %856 }
 0x109   : > { %v366_v30 = vadd.bf16 1065369472, %v857_v28 }
 0x10b   : > { %v367_v31 = vmul.bf16 %v366_v30, %v361_v29 }
 0x10d   : > { %771 = vmatmul.mubr.bf16.vlgmr.msra.gmra.mrb[0].mxu1 %v367_v31 }
 0x1e0   : > { %v473_v41 = vpop.f32.mrb[0].mxu1 }
 0x1e1   : > { %v772_v42 = vpop.f32.mrb[1].mxu1  ;;  %v474_v44 = vadd.f32 %v704_v40, %v473_v41 }
 0x1e2   : > { %v476_v43 = vpop.f32.mrb[2].mxu1 }
 0x1e3   : > { %v477_v45 = vadd.f32 %v704_v40, %v476_v43  ;;  %v773_v46 = vpop.f32.mrb[3].mxu1 }
 0x1e5   : > { %v480_v47 = vpack.c.bf16 %v477_v45, %v474_v44 }
 0x1e7   : > { %v481_v48 = vmul.bf16 %v480_v47, %v480_v47  ;;  %v483_v54 = vmul.bf16 1056980736, %v480_v47 }
 0x1e9   : > { %v482_v49 = vmul.bf16 %v481_v48, %v480_v47 }
 0x1eb   : > { %v484_v50 = vmul.bf16 1027030327, %v482_v49 }
 0x1ed   : > { %v485_v51 = vadd.bf16 %v484_v50, %v480_v47 }
 0x1ef   : > { %v486_v52 = vmul.bf16 1061961548, %v485_v51 }
 0x1f1   : > { %858 = vtanh.bf16 %v486_v52 }
 0x1fc   : > { %v859_v53 = vpop.eup %858 }
 0x1fd   : > { %v488_v55 = vadd.bf16 1065369472, %v859_v53 }
 0x1ff   : > { %v489_v56 = vmul.bf16 %v488_v55, %v483_v54 }
 0x201   : > { %791 = vmatmul.mubr.bf16.vlgmr.msra.gmra.mrb[4].mxu0 %v489_v56 }
 0x2d4   : > { %v595_v58 = vpop.f32.mrb[4].mxu0 }
 0x2d5   : > { %v792_v59 = vpop.f32.mrb[5].mxu0  ;;  %v596_v61 = vadd.f32 %v713_v57, %v595_v58 }
 0x2d6   : > { %v598_v60 = vpop.f32.mrb[6].mxu0 }
 0x2d7   : > { %v599_v62 = vadd.f32 %v713_v57, %v598_v60  ;;  %v793_v63 = vpop.f32.mrb[7].mxu0 }
 0x2d9   : > { %v602_v0 = vpack.c.bf16 %v599_v62, %v596_v61 }
 0x2db   : > { %v603_v1 = vmul.bf16 %v602_v0, %v602_v0  ;;  %v605_v7 = vmul.bf16 1056980736, %v602_v0 }
 0x2dd   : > { %v604_v2 = vmul.bf16 %v603_v1, %v602_v0 }
 0x2df   : > { %v606_v3 = vmul.bf16 1027030327, %v604_v2 }
 0x2e1   : > { %v607_v4 = vadd.bf16 %v606_v3, %v602_v0 }
 0x2e3   : > { %v608_v5 = vmul.bf16 1061961548, %v607_v4 }
 0x2e5   : > { %860 = vtanh.bf16 %v608_v5 }
 0x2f0   : > { %v861_v6 = vpop.eup %860 }
 0x2f1   : > { %v610_v8 = vadd.bf16 1065369472, %v861_v6 }
 0x2f3   : > { %v611_v9 = vmul.bf16 %v610_v8, %v605_v7 }
 0x2f5   : > { %v612_v10 = vunpack.c.l.bf16 %v611_v9  ;;  %v613_v11 = vunpack.c.h.bf16 %v611_v9 }
 0x2f7   : > { %615 = vst.msk [vmem:[%s272_s19] sm:$0xff] %vm614_vm4, %v612_v10  ;;  %616 = vst.msk [vmem:[%s272_s19 + $0x8] sm:$0xff] %vm614_vm4, %v613_v11 }
 0x2f8   : > { %875 = shalt.err (!%p872_p3)
}
 0x2f9   : > { %s876_s14 = scalar_lea.hbm %s1109_s23, 256  ;;  %s880_s17 = scalar_lea.hbm %s1161_s7, 768 }
 0x2fa   : > { %p877_p4 = scmp.ne.s32.totalorder %s1109_s23, %s876_s14  ;;  %p881_p9 = scmp.lt.u32.totalorder %s1109_s23, %s1161_s7 }
 0x2fb   : > { %p882_p10 = scmp.lt.u32.totalorder %s880_s17, %s876_s14  ;;  %p884_p12 = scmp.lt.u32.totalorder %s876_s14, %s1109_s23 }
 0x2fc   : > { %p878_p7 = pnand %p877_p4, %p1010_p5 }
 0x2fd   : > { %p883_p11 = por %p882_p10, %p881_p9 }
 0x2fe   : > { %p879_p8 = pneg %p878_p7 }
 0x2ff   : > { %p885_p13 = por %p884_p12, %p883_p11 }
 0x301   : > { %p886_p0 = pnand %p885_p13, %p879_p8 }
 0x303   : > { %889 = shalt.err (!%p886_p0)
}
 0x304   : > { %s930_s21 = smov 128   ;;  %s931_s22 = smov 8  }
 0x305   : > { %794 = dma.vmem_to_hbm [thread:$0]  (%p1010_p5), %s1111_s20, 256, %s1109_s23, %s1113_s29, %s930_s21, %s930_s21, %s931_s22  }
 0x306 PF: > { %p800_p1 = scmp.ge.s32.totalorder %s924_s27, 2  ;;  %s646_s28 = sand.u32 1, %s912_s24  }
 0x307   : > { %s647_s8 = scalar_lea.sflag [#allocation3], %s646_s28 }
 0x308   : > { %p797_p2 = pnand %p800_p1, %p1014_p6 }
 0x30a   : > { %907 = dma.done.wait (!%p797_p2), %s647_s8, 256  }
 0x30b   : > { %909 = vsyncadd (!%p797_p2), %s647_s8, 4294967040  ;;  %p17_p3 = scmp.ge.s32.totalorder %s997_s30, 5   ;;  %s1164_s24 = smov %s916_s25 }
 0x30c   : > { %s1165_s25 = smov %s920_s26  ;;  %s1166_s26 = smov %s1008_s10 }
 0x30d   : > { %s1167_s27 = smov %s997_s30  ;;  %19 = sbr.rel (!%p17_p3) target bundleno = 3 (0x3), region = 83 }
 0x314   :  { %652 = vsyncpa [#allocation3], 1 }
 0x315   :  { %654 = vsyncpa [#allocation3 + $0x1], 1 }

</bundles_post_ra>
